<compile_context>
chip_gen: v7x
topology: tpu7x:2x2x1
jax: 0.10.0
libtpu: 0.0.40
codegen_flags: <defaults>
</compile_context>

<pallas_src>
import jax
import jax.numpy as jnp
from jax.experimental import pallas as pl
from jax.experimental.pallas import tpu as pltpu


def latent_sampler_kernel(x_ref, eps_ref, w_ref, b_ref, z_ref, mean_ref, logvar_ref):
    # One fused MXU pass: (tb, D_in) @ (D_in, 2L) + bias -> [mean | log_var].
    ml = jnp.dot(x_ref[...], w_ref[...],
                 preferred_element_type=jnp.float32) + b_ref[...]
    L = mean_ref.shape[-1]
    mean = ml[:, :L]
    log_var = ml[:, L:]

    # Reparameterization trick: z = mean + eps * exp(0.5 * log_var).
    z = mean + eps_ref[...].astype(jnp.float32) * jnp.exp(0.5 * log_var)

    # Direct per-output stores (no in-kernel concat, no packed slab).
    mean_ref[...] = mean.astype(mean_ref.dtype)
    logvar_ref[...] = log_var.astype(logvar_ref.dtype)
    z_ref[...] = z.astype(z_ref.dtype)


def fuse_linear_params(w_mean, b_mean, w_logvar, b_logvar):
    """Fuse the two Linear layers ONCE at parameter-setup time (not per call)."""
    L = w_mean.shape[1]
    w_fused = jnp.concatenate([w_mean, w_logvar], axis=1)                  # (D_in, 2L)
    b_fused = jnp.concatenate([b_mean.reshape(1, L),
                               b_logvar.reshape(1, L)], axis=1)            # (1, 2L)
    return w_fused, b_fused


def latent_sampler(x, eps, w_fused, b_fused, *,
                   max_tile_b=1024, vmem_budget_bytes=None):
    B, D_in = x.shape
    two_L = w_fused.shape[-1]
    L = two_L // 2
    assert eps.shape == (B, L)
    assert b_fused.shape == (1, two_L)

    # ---- size the batch tile from a VMEM budget (v5e-safe default) ----
    if vmem_budget_bytes is None:
        vmem_budget_bytes = 16 * 1024 * 1024
    w_bytes = 2 * (D_in * two_L + two_L) * jnp.dtype(w_fused.dtype).itemsize  # double-buffered resident
    per_row = 2 * (D_in * jnp.dtype(x.dtype).itemsize       # x tile (double-buffered)
                   + L * jnp.dtype(eps.dtype).itemsize      # eps tile
                   + 3 * L * 4)                             # three f32 output tiles
    tb = int(max(8, (vmem_budget_bytes - w_bytes) // max(per_row, 1)))
    tb = min(tb, max_tile_b, B)
    if tb < B:
        tb = max(8, (tb // 8) * 8)      # sublane-aligned partial tiles
    grid = (pl.cdiv(B, tb),)

    vmem_limit = int(min(128 * 1024 * 1024, w_bytes + per_row * tb + (2 << 20)))

    row_spec = lambda i: (i, 0)
    const_spec = lambda i: (0, 0)

    z, mean, log_var = pl.pallas_call(
        latent_sampler_kernel,
        out_shape=(
            jax.ShapeDtypeStruct((B, L), jnp.float32),   # z
            jax.ShapeDtypeStruct((B, L), jnp.float32),   # mean
            jax.ShapeDtypeStruct((B, L), jnp.float32),   # log_var
        ),
        grid=grid,
        in_specs=[
            pl.BlockSpec((tb, D_in), row_spec),          # x: streamed per batch tile
            pl.BlockSpec((tb, L), row_spec),             # eps: streamed per batch tile
            pl.BlockSpec((D_in, two_L), const_spec),     # fused weight: resident
            pl.BlockSpec((1, two_L), const_spec),        # fused bias: resident
        ],
        out_specs=(
            pl.BlockSpec((tb, L), row_spec),
            pl.BlockSpec((tb, L), row_spec),
            pl.BlockSpec((tb, L), row_spec),
        ),
        compiler_params=pltpu.CompilerParams(
            dimension_semantics=("parallel",),
            vmem_limit_bytes=vmem_limit,
        ),
    )(x, eps, w_fused, b_fused)
    return z, mean, log_var


if __name__ == "__main__":
    key = jax.random.PRNGKey(0)
    B, D_in, L = 8, 32, 16

    k_x, k_eps, k_wm, k_bm, k_wv, k_bv = jax.random.split(key, 6)

    # PyTorch Linear default init: U(-1/sqrt(D_in), 1/sqrt(D_in))
    bound = 1.0 / float(jnp.sqrt(jnp.float32(D_in)))
    w_mean = jax.random.uniform(k_wm, (D_in, L), jnp.float32, -bound, bound)
    b_mean = jax.random.uniform(k_bm, (L,), jnp.float32, -bound, bound)
    w_logvar = jax.random.uniform(k_wv, (D_in, L), jnp.float32, -bound, bound)
    b_logvar = jax.random.uniform(k_bv, (L,), jnp.float32, -bound, bound)

    x = jax.random.normal(k_x, (B, D_in), jnp.float32)
    eps = jax.random.normal(k_eps, (B, L), jnp.float32)   # torch.randn_like equivalent

    # Fuse parameters once (setup-time, not per forward call).
    w_fused, b_fused = fuse_linear_params(w_mean, b_mean, w_logvar, b_logvar)

    z, mean, log_var = latent_sampler(x, eps, w_fused, b_fused)
    jax.block_until_ready((z, mean, log_var))

    # Pure-JAX reference check (now fully deterministic, including z).
    mean_ref = x @ w_mean + b_mean
    logvar_ref = x @ w_logvar + b_logvar
    z_ref = mean_ref + eps * jnp.exp(0.5 * logvar_ref)
    assert jnp.allclose(mean, mean_ref, atol=1e-5, rtol=1e-5)
    assert jnp.allclose(log_var, logvar_ref, atol=1e-5, rtol=1e-5)
    assert jnp.allclose(z, z_ref, atol=1e-5, rtol=1e-5)

    print("KERNEL_OK")
</pallas_src>

<mosaic_0001>
module attributes {stable_mosaic.version = 11 : i64} {
  func.func @latent_sampler_kernel(%arg0: i32, %arg1: memref<8x32xf32, #tpu.memory_space<vmem>>, %arg2: memref<8x16xf32, #tpu.memory_space<vmem>>, %arg3: memref<32x32xf32, #tpu.memory_space<vmem>>, %arg4: memref<1x32xf32, #tpu.memory_space<vmem>>, %arg5: memref<8x16xf32, #tpu.memory_space<vmem>>, %arg6: memref<8x16xf32, #tpu.memory_space<vmem>>, %arg7: memref<8x16xf32, #tpu.memory_space<vmem>>) attributes {dimension_semantics = [#tpu.dimension_semantics<parallel>], iteration_bounds = array<i64: 1>, scalar_prefetch = 0 : i64, scratch_operands = 0 : i64, tpu.core_type = #tpu.core_type<tc>, window_params = [{transform_indices = @transform_0, window_bounds = array<i64: 8, 32>}, {transform_indices = @transform_1, window_bounds = array<i64: 8, 16>}, {pipeline_mode = #tpu.pipeline_mode<synchronous>, transform_indices = @transform_2, window_bounds = array<i64: 32, 32>}, {pipeline_mode = #tpu.pipeline_mode<synchronous>, transform_indices = @transform_3, window_bounds = array<i64: 1, 32>}, {transform_indices = @transform_4, window_bounds = array<i64: 8, 16>}, {transform_indices = @transform_5, window_bounds = array<i64: 8, 16>}, {transform_indices = @transform_6, window_bounds = array<i64: 8, 16>}]} {
    %c0 = arith.constant 0 : index
    %c0_0 = arith.constant 0 : index
    %0 = vector.load %arg1[%c0, %c0_0] : memref<8x32xf32, #tpu.memory_space<vmem>>, vector<8x32xf32>
    %c0_1 = arith.constant 0 : index
    %c0_2 = arith.constant 0 : index
    %1 = vector.load %arg3[%c0_1, %c0_2] : memref<32x32xf32, #tpu.memory_space<vmem>>, vector<32x32xf32>
    %cst = arith.constant dense<0.000000e+00> : vector<8x32xf32>
    %2 = tpu.matmul %0, %1, %cst {dimension_numbers = #tpu.dot_dimension_numbers<[1], [0], [0], [1], [0, 0, 1, 1], [], []>} : vector<8x32xf32>, vector<32x32xf32>, vector<8x32xf32> -> vector<8x32xf32>
    %c0_3 = arith.constant 0 : index
    %c0_4 = arith.constant 0 : index
    %3 = vector.load %arg4[%c0_3, %c0_4] : memref<1x32xf32, #tpu.memory_space<vmem>>, vector<1x32xf32>
    %4 = vector.broadcast %3 : vector<1x32xf32> to vector<8x32xf32>
    %5 = arith.addf %2, %4 : vector<8x32xf32>
    %6 = vector.extract_strided_slice %5 {offsets = [0, 0], sizes = [8, 16], strides = [1, 1]} : vector<8x32xf32> to vector<8x16xf32>
    %7 = vector.extract_strided_slice %5 {offsets = [0, 16], sizes = [8, 16], strides = [1, 1]} : vector<8x32xf32> to vector<8x16xf32>
    %c0_5 = arith.constant 0 : index
    %c0_6 = arith.constant 0 : index
    %8 = vector.load %arg2[%c0_5, %c0_6] : memref<8x16xf32, #tpu.memory_space<vmem>>, vector<8x16xf32>
    %cst_7 = arith.constant 5.000000e-01 : f32
    %9 = vector.broadcast %cst_7 : f32 to vector<8x16xf32>
    %10 = arith.mulf %9, %7 : vector<8x16xf32>
    %11 = math.exp %10 : vector<8x16xf32>
    %12 = arith.mulf %8, %11 : vector<8x16xf32>
    %13 = arith.addf %6, %12 : vector<8x16xf32>
    %c0_8 = arith.constant 0 : index
    %c0_9 = arith.constant 0 : index
    %14 = vector.load %arg6[%c0_8, %c0_9] : memref<8x16xf32, #tpu.memory_space<vmem>>, vector<8x16xf32>
    tpu.vector_store %arg6[%c0_8, %c0_9], %6 {strides = array<i32>} : memref<8x16xf32, #tpu.memory_space<vmem>>, vector<8x16xf32>,
    %c0_10 = arith.constant 0 : index
    %c0_11 = arith.constant 0 : index
    %15 = vector.load %arg7[%c0_10, %c0_11] : memref<8x16xf32, #tpu.memory_space<vmem>>, vector<8x16xf32>
    tpu.vector_store %arg7[%c0_10, %c0_11], %7 {strides = array<i32>} : memref<8x16xf32, #tpu.memory_space<vmem>>, vector<8x16xf32>,
    %c0_12 = arith.constant 0 : index
    %c0_13 = arith.constant 0 : index
    %16 = vector.load %arg5[%c0_12, %c0_13] : memref<8x16xf32, #tpu.memory_space<vmem>>, vector<8x16xf32>
    tpu.vector_store %arg5[%c0_12, %c0_13], %13 {strides = array<i32>} : memref<8x16xf32, #tpu.memory_space<vmem>>, vector<8x16xf32>,
    return
  }
  func.func @transform_0(%arg0: i32) -> (i32, i32) {
    %c0_i32 = arith.constant 0 : i32
    %c0_i32_0 = arith.constant 0 : i32
    return %arg0, %c0_i32 : i32, i32
  }
  func.func @transform_1(%arg0: i32) -> (i32, i32) {
    %c0_i32 = arith.constant 0 : i32
    %c0_i32_0 = arith.constant 0 : i32
    return %arg0, %c0_i32 : i32, i32
  }
  func.func @transform_2(%arg0: i32) -> (i32, i32) {
    %c0_i32 = arith.constant 0 : i32
    %c0_i32_0 = arith.constant 0 : i32
    %c0_i32_1 = arith.constant 0 : i32
    return %c0_i32, %c0_i32_0 : i32, i32
  }
  func.func @transform_3(%arg0: i32) -> (i32, i32) {
    %c0_i32 = arith.constant 0 : i32
    %c0_i32_0 = arith.constant 0 : i32
    %c0_i32_1 = arith.constant 0 : i32
    return %c0_i32, %c0_i32_0 : i32, i32
  }
  func.func @transform_4(%arg0: i32) -> (i32, i32) {
    %c0_i32 = arith.constant 0 : i32
    %c0_i32_0 = arith.constant 0 : i32
    return %arg0, %c0_i32 : i32, i32
  }
  func.func @transform_5(%arg0: i32) -> (i32, i32) {
    %c0_i32 = arith.constant 0 : i32
    %c0_i32_0 = arith.constant 0 : i32
    return %arg0, %c0_i32 : i32, i32
  }
  func.func @transform_6(%arg0: i32) -> (i32, i32) {
    %c0_i32 = arith.constant 0 : i32
    %c0_i32_0 = arith.constant 0 : i32
    return %arg0, %c0_i32 : i32, i32
  }
}

</mosaic_0001>

<bundles_post_ra>
// kernel: tpu_custom_call.1
= control target key start
LH: loop header
LB: loop body
LE: loop exit
PB: predicated region body
PF: predicated region fallthrough
CT: control target
= control target key end

     0   :  { %12 = vsyncpa [#allocation3], 0  ;;  %s509_s0 = inlined_call_operand.hbm [shape: f32[8,32], index: 0, kind: input, shape index: {}]   ;;  %s510_s1 = inlined_call_operand.hbm [shape: f32[8,16], index: 1, kind: input, shape index: {}]   ;;  %s511_s2 = inlined_call_operand.hbm [shape: f32[32,32], index: 2, kind: input, shape index: {}]   ;;  %s512_s3 = inlined_call_operand.vmem [shape: f32[1,32], index: 3, kind: input, shape index: {}]   ;;  %s513_s4 = inlined_call_operand.hbm [shape: f32[8,16], index: 4, kind: output, shape index: {0}]   ;;  %s514_s5 = inlined_call_operand.hbm [shape: f32[8,16], index: 5, kind: output, shape index: {1}]   ;;  %s515_s6 = inlined_call_operand.hbm [shape: f32[8,16], index: 6, kind: output, shape index: {2}]  }
   0x1   :  { %13 = vsyncpa [#allocation6], 0 }
   0x2   :  { %14 = vsyncpa [#allocation4], 0 }
   0x3   :  { %15 = vsyncpa [#allocation10], 0  ;;  %s384_s21 = smov [#allocation5]   ;;  %s385_s23 = smov [#allocation2]  }
   0x4   :  { %s32_s22 = sshll.u32 %s384_s21, 4  ;;  %s22_s24 = sshll.u32 %s385_s23, 4  ;;  %s33_s22 = int_to_ptr.vmem [resolvable:$true] %s32_s22  ;;  %s23_s24 = int_to_ptr.vmem [resolvable:$true] %s22_s24 }
   0x5   :  { %s244_s27 = scalar_lea.hbm %s510_s1, 128 }
   0x6   :  { %p245_p0 = scmp.ne.s32.totalorder %s510_s1, %s244_s27  ;;  %p248_p1 = scmp.lt.u32.totalorder %s244_s27, %s510_s1 }
   0x8   :  { %p250_p2 = pnand %p248_p1, %p245_p0 }
   0xa   :  { %253 = shalt.err (!%p250_p2)
}
   0xb   :  { %s254_s8 = scalar_lea.vmem %s33_s22, 128  ;;  %p259_p4 = scmp.lt.s32.totalorder %s33_s22, %s33_s22 }
   0xc   :  { %p255_p3 = scmp.ne.s32.totalorder %s33_s22, %s254_s8  ;;  %p260_p5 = scmp.lt.s32.totalorder %s254_s8, %s254_s8 }
   0xe   :  { %p261_p6 = por %p260_p5, %p259_p4 }
  0x10   :  { %p262_p7 = pnand %p261_p6, %p255_p3 }
  0x12   :  { %265 = shalt.err (!%p262_p7)
}
  0x13   :  { %35 = dma.hbm_to_vmem [thread:$0]  %s510_s1, 128, %s33_s22, [#allocation6]  }
  0x14   :  { %s266_s13 = scalar_lea.hbm %s509_s0, 128 }
  0x15   :  { %p267_p8 = scmp.ne.s32.totalorder %s509_s0, %s266_s13  ;;  %p270_p9 = scmp.lt.u32.totalorder %s266_s13, %s509_s0 }
  0x17   :  { %p272_p10 = pnand %p270_p9, %p267_p8 }
  0x19   :  { %275 = shalt.err (!%p272_p10)
}
  0x1a   :  { %s276_s18 = scalar_lea.vmem %s23_s24, 128  ;;  %p281_p12 = scmp.lt.s32.totalorder %s23_s24, %s23_s24 }
  0x1b   :  { %p277_p11 = scmp.ne.s32.totalorder %s23_s24, %s276_s18  ;;  %p282_p13 = scmp.lt.s32.totalorder %s276_s18, %s276_s18 }
  0x1d   :  { %p283_p0 = por %p282_p13, %p281_p12 }
  0x1f   :  { %p284_p1 = pnand %p283_p0, %p277_p11 }
  0x21   :  { %287 = shalt.err (!%p284_p1)
}
  0x22   :  { %25 = dma.hbm_to_vmem [thread:$0]  %s509_s0, 128, %s23_s24, [#allocation3]  }
  0x23   :  { %s386_s20 = smov [#allocation7]   ;;  %s288_s25 = scalar_lea.hbm %s511_s2, 512 }
  0x24   :  { %s41_s21 = sshll.u32 %s386_s20, 4  ;;  %p289_p2 = scmp.ne.s32.totalorder %s511_s2, %s288_s25  ;;  %s42_s21 = int_to_ptr.vmem [resolvable:$true] %s41_s21 }
  0x25   :  { %p292_p3 = scmp.lt.u32.totalorder %s288_s25, %s511_s2 }
  0x27   :  { %p294_p4 = pnand %p292_p3, %p289_p2 }
  0x29   :  { %297 = shalt.err (!%p294_p4)
}
  0x2a   :  { %s298_s30 = scalar_lea.vmem %s42_s21, 512  ;;  %p303_p6 = scmp.lt.s32.totalorder %s42_s21, %s42_s21 }
  0x2b   :  { %p299_p5 = scmp.ne.s32.totalorder %s42_s21, %s298_s30  ;;  %p304_p7 = scmp.lt.s32.totalorder %s298_s30, %s298_s30 }
  0x2d   :  { %p305_p8 = por %p304_p7, %p303_p6 }
  0x2f   :  { %p306_p9 = pnand %p305_p8, %p299_p5 }
  0x31   :  { %309 = shalt.err (!%p306_p9)
}
  0x32   :  { %s387_s0 = smov 128   ;;  %s388_s24 = smov 8  }
  0x33   :  { %47 = dma.hbm_to_vmem [thread:$0]  %s511_s2, 512, %s42_s21, [#allocation6], %s387_s0, %s387_s0, %s388_s24  }
  0x34   :  { %376 = dma.done.wait [#allocation3], 128  }
  0x35   :  { %377 = vsyncadd [#allocation3], 4294967168 }
  0x36   :  { %378 = dma.done.wait [#allocation6], 640  }
  0x37   :  { %379 = vsyncadd [#allocation6], 4294966656  ;;  %v389_v0 = vmov 0.0|0.0   ;;  %vm390_vm0 = vmmov 0   ;;  %v391_v1 = vmov 0.0   ;;  %v60_v2 = vld [vmem:[#allocation7] sm:$0xff] }
  0x38   :  { %224 = vmatprep.subr.bf16.mxu0 %v389_v0  ;;  %221 = vmatprep.mubr.msk.f32.mxu0 %vm390_vm0, %v391_v1  ;;  %v61_v3 = vld [vmem:[#allocation7 + $0x8] sm:$0xff]  ;;  %v62_v4 = vld [vmem:[#allocation7 + $0x10] sm:$0xff]  ;;  %v63_v6 = vld [vmem:[#allocation7 + $0x18] sm:$0xff]  ;;  %vm71_vm1 = vcmask 261120   ;;  %vm155_vm2 = vcmask 130048   ;;  %s392_s10 = smov [#allocation9]  }
  0x39   :  { %v225_v5 = vpack.c.bf16 %v61_v3, %v60_v2  ;;  %v228_v7 = vpack.c.bf16 %v63_v6, %v62_v4  ;;  %v59_v8 = vld [vmem:[#allocation2] sm:$0xff]  ;;  %s179_s11 = sshll.u32 %s392_s10, 4  ;;  %s180_s11 = int_to_ptr.vmem [resolvable:$true] %s179_s11 }
  0x3a   :  { %v206_v9 = vld [vmem:[%s512_s3] ss:$0 sm:$0xff]  ;;  %s310_s12 = scalar_lea.vmem %s180_s11, 128  ;;  %p315_p11 = scmp.lt.s32.totalorder %s180_s11, %s180_s11 }
  0x3b   :  { %226 = vmatpush3.bf16.msra.mxu0 %v225_v5  ;;  %p311_p10 = scmp.ne.s32.totalorder %s180_s11, %s310_s12  ;;  %p316_p12 = scmp.lt.s32.totalorder %s310_s12, %s310_s12 }
  0x3c   :  { %227 = vmatprep.subr.bf16.mxu0 %v389_v0 }
  0x3d   :  { %p317_p13 = por %p316_p12, %p315_p11 }
  0x3f   :  { %229 = vmatpush3.bf16.msra.mxu0 %v228_v7  ;;  %p318_p0 = pnand %p317_p13, %p311_p10 }
  0x42   :  { %222 = vmatmul.mubr.msk.f32.vlgmr.msra.gmra.mrb[0].mxu0 %vm71_vm1, %v59_v8 }
 0x115   :  { %v141_v10 = vpop.f32.mrb[0].mxu0 }
 0x116   :  { %v142_v11 = vadd.f32 %v206_v9, %v141_v10  ;;  %v223_v12 = vpop.f32.mrb[1].mxu0 }
 0x118   :  { %v146_v13 = vmul.f32 0.5, %v142_v11  ;;  %156 = vst.msk [vmem:[#allocation9] sm:$0xff] %vm155_vm2, %v142_v11 }
 0x11a   :  { %v147_v14 = vmul.f32 1.442695, %v146_v13 }
 0x11c   :  { %242 = vpow2.f32 %v147_v14 }
 0x11d   :  { %321 = shalt.err (!%p318_p0)
}
 0x11e   :  { %s322_s14 = scalar_lea.hbm %s514_s5, 128 }
 0x11f   :  { %p323_p1 = scmp.ne.s32.totalorder %s514_s5, %s322_s14  ;;  %p326_p2 = scmp.lt.u32.totalorder %s322_s14, %s514_s5 }
 0x121   :  { %p328_p3 = pnand %p326_p2, %p323_p1 }
 0x123   :  { %331 = shalt.err (!%p328_p3)
}
 0x124   :  { %182 = dma.vmem_to_hbm [thread:$0]  %s180_s11, 128, %s514_s5, [#allocation10]   ;;  %v145_v16 = vld [vmem:[#allocation5] sm:$0xff] }
 0x125   :  { %s393_s20 = smov 112   ;;  %s394_s21 = smov [#allocation8]  }
 0x126   :  { %v243_v15 = vpop.eup %242  ;;  %s169_s22 = sshll.u32 %s394_s21, 4  ;;  %s395_s23 = smov [#allocation11]   ;;  %s170_s22 = int_to_ptr.vmem [resolvable:$true] %s169_s22 }
 0x127   :  { %150 = vrot.lane.b32.xlu0 %v243_v15, %s393_s20  ;;  %s189_s25 = sshll.u32 %s395_s23, 4  ;;  %s332_s5 = scalar_lea.vmem %s170_s22, 128  ;;  %s190_s25 = int_to_ptr.vmem [resolvable:$true] %s189_s25 }
 0x128   :  { %p333_p4 = scmp.ne.s32.totalorder %s170_s22, %s332_s5  ;;  %p337_p5 = scmp.lt.s32.totalorder %s170_s22, %s170_s22 }
 0x129   :  { %p338_p6 = scmp.lt.s32.totalorder %s332_s5, %s332_s5 }
 0x12b   :  { %158 = vrot.lane.b32.xlu0 %v142_v11, %s393_s20  ;;  %p339_p7 = por %p338_p6, %p337_p5 }
 0x12d   :  { %p340_p8 = pnand %p339_p7, %p333_p4 }
 0x199   :  { %v151_v17 = vpop.permute.xlu0 %150 }
 0x19a   :  { %v153_v18 = vmul.f32 %v151_v17, %v145_v16 }
 0x19c   :  { %v154_v19 = vadd.f32 %v153_v18, %v142_v11 }
 0x19d   :  { %v159_v20 = vpop.permute.xlu0 %158 }
 0x19e   :  { %161 = vst.msk [vmem:[#allocation11] sm:$0xff] %vm155_vm2, %v159_v20  ;;  %162 = vst.msk [vmem:[#allocation8] sm:$0xff] %vm155_vm2, %v154_v19 }
 0x19f   :  { %343 = shalt.err (!%p340_p8)
}
 0x1a0   :  { %s344_s28 = scalar_lea.hbm %s513_s4, 128 }
 0x1a1   :  { %p345_p9 = scmp.ne.s32.totalorder %s513_s4, %s344_s28  ;;  %p348_p10 = scmp.lt.u32.totalorder %s344_s28, %s513_s4 }
 0x1a3   :  { %p350_p11 = pnand %p348_p10, %p345_p9 }
 0x1a5   :  { %353 = shalt.err (!%p350_p11)
}
 0x1a6   :  { %172 = dma.vmem_to_hbm [thread:$0]  %s170_s22, 128, %s513_s4, [#allocation4]  }
 0x1a7   :  { %s354_s2 = scalar_lea.vmem %s190_s25, 128  ;;  %p359_p13 = scmp.lt.s32.totalorder %s190_s25, %s190_s25 }
 0x1a8   :  { %p355_p12 = scmp.ne.s32.totalorder %s190_s25, %s354_s2  ;;  %p360_p0 = scmp.lt.s32.totalorder %s354_s2, %s354_s2 }
 0x1aa   :  { %p361_p1 = por %p360_p0, %p359_p13 }
 0x1ac   :  { %p362_p2 = pnand %p361_p1, %p355_p12 }
 0x1ae   :  { %365 = shalt.err (!%p362_p2)
}
 0x1af   :  { %s366_s11 = scalar_lea.hbm %s515_s6, 128 }
 0x1b0   :  { %p367_p3 = scmp.ne.s32.totalorder %s515_s6, %s366_s11  ;;  %p370_p4 = scmp.lt.u32.totalorder %s366_s11, %s515_s6 }
 0x1b2   :  { %p372_p5 = pnand %p370_p4, %p367_p3 }
 0x1b4   :  { %375 = shalt.err (!%p372_p5)
}
 0x1b5   :  { %192 = dma.vmem_to_hbm [thread:$0]  %s190_s25, 128, %s515_s6, [#allocation10]  }
 0x1b6   :  { %380 = dma.done.wait [#allocation4], 128  }
 0x1b7   :  { %381 = vsyncadd [#allocation4], 4294967168 }
 0x1b8   :  { %382 = dma.done.wait [#allocation10], 256  }
 0x1b9   :  { %383 = vsyncadd [#allocation10], 4294967040 }
 0x1ba   :  { %202 = vsyncpa [#allocation3], 1 }
 0x1bb   :  { %203 = vsyncpa [#allocation6], 1 }
 0x1bc   :  { %204 = vsyncpa [#allocation4], 1 }
 0x1bd   :  { %205 = vsyncpa [#allocation10], 1 }

</bundles_post_ra>
